<compile_context>
chip_gen: v7x
topology: tpu7x:2x2x1
jax: 0.10.0
libtpu: 0.0.40
codegen_flags: <defaults>
</compile_context>

<pallas_src>
import jax
import jax.numpy as jnp
from jax import lax
from jax.experimental import pallas as pl
from jax.experimental.pallas import tpu as pltpu


def _round_up(x, m):
    return ((x + m - 1) // m) * m


def make_truncated_loss_kernel(c, g, L, q, k):
    """c: #classes, g: samples per group row, L = g*c lanes per row."""
    lqk = (1.0 - k ** q) / q          # scalar constant
    q = float(q)

    def kernel(logits_ref, side_ref, out_ref):
        x = logits_ref[...].astype(jnp.float32)        # [TG, L]
        side = side_ref[...]                            # [TG, 2g] f32
        w = side[:, 0:g]                                # [TG, g]  weight[indexes] (0 on pad)
        tt = side[:, g:2 * g]                           # [TG, g]  absolute target lane (exact ints)

        # Constant block-diagonal segment matrices built from iota (no int div/mod).
        d0 = (lax.broadcasted_iota(jnp.int32, (L, g), 0)
              - c * lax.broadcasted_iota(jnp.int32, (L, g), 1))
        b_sum = ((d0 >= 0) & (d0 < c)).astype(jnp.float32)      # [L, g] segmented-sum
        d1 = (lax.broadcasted_iota(jnp.int32, (g, L), 1)
              - c * lax.broadcasted_iota(jnp.int32, (g, L), 0))
        b_exp = ((d1 >= 0) & (d1 < c)).astype(jnp.float32)      # [g, L] sample -> lanes expand

        # Shared (per group-row) stabilizer; cancels exactly in the softmax ratio.
        m = jnp.max(x, axis=1, keepdims=True)                                   # [TG, 1]
        e = jnp.exp(x - m)                                                      # [TG, L]
        se = jnp.dot(e, b_sum, preferred_element_type=jnp.float32)              # [TG, g]

        # Target-logit pick: expand per-sample absolute target lane, compare, segment-sum.
        texp = jnp.dot(tt, b_exp, preferred_element_type=jnp.float32)           # [TG, L]
        lane = lax.broadcasted_iota(jnp.int32, x.shape, 1)
        sel = lane == texp.astype(jnp.int32)
        t_logit = jnp.dot(jnp.where(sel, x, 0.0), b_sum,
                          preferred_element_type=jnp.float32)                   # [TG, g]

        # log-space tail: Yg**q = exp(q * (t_logit - m - log(se)))
        log_yg = t_logit - m - jnp.log(se)                                      # [TG, g]
        lq = (1.0 - jnp.exp(q * log_yg)) / q
        loss = (lq - lqk) * w                                                   # pad rows: w == 0

        partial = jnp.sum(loss, axis=0, keepdims=True)                          # [1, g]
        row0 = (lax.broadcasted_iota(jnp.int32, (8, g), 0) == 0).astype(jnp.float32)
        out_ref[0] = row0 * partial            # full (8, g) block written: row 0 = sums, rest 0

    return kernel


def truncated_loss_forward(logits, targets, indexes, weight, q=0.7, k=0.5):
    """Pallas equivalent of TruncatedLoss.forward.

    logits : [N, C] float32 or bfloat16
    targets: [N]    int32
    indexes: [N]    int32
    weight : [DS,1] float32 (the module's buffer; ones at init)
    """
    n, c = logits.shape
    itemsize = jnp.dtype(logits.dtype).itemsize

    # glue: parameter-table gather
    w_g = weight[indexes].reshape(n).astype(jnp.float32)

    # --- lane-dense grouping geometry --------------------------------------
    g = max(1, 128 // c)                      # samples per group row
    L = g * c                                 # lanes per group row
    lanes_L = _round_up(L, 128)               # VMEM lane padding of logits block
    lanes_S = _round_up(2 * g, 128)           # VMEM lane padding of side block
    G = -(-n // g)                            # group rows needed

    # --- tile size by bytes (>= ~1 MiB per logits block), multiple of 8 ----
    target_bytes = 2 << 20
    tg = max(8, (target_bytes // (lanes_L * itemsize)) // 8 * 8)

    # --- per-generation VMEM budget -----------------------------------------
    try:
        vmem_cap = int(pltpu.get_tpu_info().vmem_capacity_bytes)
    except Exception:
        vmem_cap = 64 << 20                   # conservative (v7x per-core) fallback
    per_row = 2 * lanes_L * itemsize + 2 * lanes_S * 4 + 8 * lanes_L * 4
    tg_fit = max(8, ((int(0.70 * vmem_cap) - (4 << 20)) // per_row) // 8 * 8)
    tg = max(8, min(tg, 2048, tg_fit, _round_up(G, 8)))

    num_tiles = -(-G // tg)
    G_pad = num_tiles * tg
    n_pad = G_pad * g
    pad = n_pad - n

    targets = targets.astype(jnp.int32)
    if pad:
        logits = jnp.pad(logits, ((0, pad), (0, 0)))   # pad rows: logits 0, target 0
        targets = jnp.pad(targets, (0, pad))
        w_g = jnp.pad(w_g, (0, pad))                   # pad rows: weight 0 -> zero loss

    logits_g = logits.reshape(G_pad, L)                # free row-major regrouping
    # absolute in-row target lane: (sample position within group)*C + target
    tt = (targets + c * (jnp.arange(n_pad, dtype=jnp.int32) % g)).astype(jnp.float32)
    side = jnp.concatenate([w_g.reshape(G_pad, g), tt.reshape(G_pad, g)], axis=1)  # [G_pad, 2g]

    est = (2 * tg * lanes_L * itemsize          # logits, double-buffered
           + 2 * tg * lanes_S * 4               # side, double-buffered
           + 8 * tg * lanes_L * 4               # f32 intermediates headroom
           + (4 << 20))
    vmem_limit = int(min(int(0.75 * vmem_cap), max(32 << 20, est)))

    kernel = make_truncated_loss_kernel(c, g, L, q, k)

    partials = pl.pallas_call(
        kernel,
        out_shape=jax.ShapeDtypeStruct((num_tiles, 8, g), jnp.float32),
        grid=(num_tiles,),
        in_specs=[
            pl.BlockSpec((tg, L), lambda i: (i, 0)),
            pl.BlockSpec((tg, 2 * g), lambda i: (i, 0)),
        ],
        out_specs=pl.BlockSpec((1, 8, g), lambda i: (i, 0, 0)),
        compiler_params=pltpu.CompilerParams(
            # Fully independent steps -> safe to shard across v7x TensorCores.
            dimension_semantics=("parallel",),
            vmem_limit_bytes=vmem_limit,
        ),
    )(logits_g, side)

    return jnp.sum(partials) / jnp.float32(n)


if __name__ == "__main__":
    key = jax.random.PRNGKey(0)
    N, C = 200, 32           # small, non-multiples of the tiling -> exercises padding/grouping
    TRAINSET_SIZE = 512      # small synthetic stand-in for 50000
    Q, K = 0.7, 0.5

    k_logits, k_targets, k_indexes = jax.random.split(key, 3)
    logits = jax.random.normal(k_logits, (N, C), dtype=jnp.float32)
    targets = jax.random.randint(k_targets, (N,), 0, C, dtype=jnp.int32)
    indexes = jax.random.randint(k_indexes, (N,), 0, TRAINSET_SIZE, dtype=jnp.int32)

    # Deterministic parameter init matching nn.Parameter(torch.ones(trainset_size, 1))
    weight = jnp.ones((TRAINSET_SIZE, 1), dtype=jnp.float32)

    loss = truncated_loss_forward(logits, targets, indexes, weight, q=Q, k=K)
    jax.block_until_ready(loss)

    # Pure-JAX reference check
    p_ref = jax.nn.softmax(logits, axis=1)
    yg = jnp.take_along_axis(p_ref, targets[:, None], axis=1)
    w = weight[indexes]
    ref = jnp.mean((1 - yg ** Q) / Q * w - (1 - K ** Q) / Q * w)
    assert jnp.allclose(loss, ref, atol=1e-5, rtol=1e-5), (loss, ref)

    # TODO(synk): update_weight (in-place parameter scatter) not implemented; only forward().
    print("KERNEL_OK")
</pallas_src>

<mosaic_0001>
module attributes {stable_mosaic.version = 11 : i64} {
  func.func @kernel(%arg0: i32, %arg1: memref<56x128xf32, #tpu.memory_space<vmem>>, %arg2: memref<56x8xf32, #tpu.memory_space<vmem>>, %arg3: memref<1x8x4xf32, #tpu.memory_space<vmem>>) attributes {dimension_semantics = [#tpu.dimension_semantics<parallel>], iteration_bounds = array<i64: 1>, scalar_prefetch = 0 : i64, scratch_operands = 0 : i64, tpu.core_type = #tpu.core_type<tc>, window_params = [{transform_indices = @transform_0, window_bounds = array<i64: 56, 128>}, {transform_indices = @transform_1, window_bounds = array<i64: 56, 8>}, {transform_indices = @transform_2, window_bounds = array<i64: 1, 8, 4>}]} {
    %c0 = arith.constant 0 : index
    %c0_0 = arith.constant 0 : index
    %0 = vector.load %arg1[%c0, %c0_0] : memref<56x128xf32, #tpu.memory_space<vmem>>, vector<56x128xf32>
    %c0_1 = arith.constant 0 : index
    %c0_2 = arith.constant 0 : index
    %1 = vector.load %arg2[%c0_1, %c0_2] : memref<56x8xf32, #tpu.memory_space<vmem>>, vector<56x8xf32>
    %2 = vector.extract_strided_slice %1 {offsets = [0, 0], sizes = [56, 4], strides = [1, 1]} : vector<56x8xf32> to vector<56x4xf32>
    %3 = vector.extract_strided_slice %1 {offsets = [0, 4], sizes = [56, 4], strides = [1, 1]} : vector<56x8xf32> to vector<56x4xf32>
    %4 = tpu.iota {dimensions = array<i32: 0>} : vector<128x4xi32>
    %5 = tpu.iota {dimensions = array<i32: 1>} : vector<128x4xi32>
    %c32_i32 = arith.constant 32 : i32
    %6 = vector.broadcast %c32_i32 : i32 to vector<128x4xi32>
    %7 = arith.muli %6, %5 : vector<128x4xi32>
    %8 = arith.subi %4, %7 : vector<128x4xi32>
    %c0_i32 = arith.constant 0 : i32
    %9 = vector.broadcast %c0_i32 : i32 to vector<128x4xi32>
    %10 = arith.cmpi sge, %8, %9 : vector<128x4xi32>
    %c32_i32_3 = arith.constant 32 : i32
    %11 = vector.broadcast %c32_i32_3 : i32 to vector<128x4xi32>
    %12 = arith.cmpi slt, %8, %11 : vector<128x4xi32>
    %13 = arith.andi %10, %12 : vector<128x4xi1>
    %14 = arith.extui %13 : vector<128x4xi1> to vector<128x4xi32>
    %15 = arith.sitofp %14 : vector<128x4xi32> to vector<128x4xf32>
    %16 = tpu.iota {dimensions = array<i32: 1>} : vector<4x128xi32>
    %17 = tpu.iota {dimensions = array<i32: 0>} : vector<4x128xi32>
    %c32_i32_4 = arith.constant 32 : i32
    %18 = vector.broadcast %c32_i32_4 : i32 to vector<4x128xi32>
    %19 = arith.muli %18, %17 : vector<4x128xi32>
    %20 = arith.subi %16, %19 : vector<4x128xi32>
    %c0_i32_5 = arith.constant 0 : i32
    %21 = vector.broadcast %c0_i32_5 : i32 to vector<4x128xi32>
    %22 = arith.cmpi sge, %20, %21 : vector<4x128xi32>
    %c32_i32_6 = arith.constant 32 : i32
    %23 = vector.broadcast %c32_i32_6 : i32 to vector<4x128xi32>
    %24 = arith.cmpi slt, %20, %23 : vector<4x128xi32>
    %25 = arith.andi %22, %24 : vector<4x128xi1>
    %26 = arith.extui %25 : vector<4x128xi1> to vector<4x128xi32>
    %27 = arith.sitofp %26 : vector<4x128xi32> to vector<4x128xf32>
    %cst = arith.constant dense<0xFF800000> : vector<56xf32>
    %28 = vector.multi_reduction <maximumf>, %0, %cst [1] : vector<56x128xf32> to vector<56xf32>
    %29 = vector.shape_cast %28 : vector<56xf32> to vector<56x1xf32>
    %30 = vector.broadcast %29 : vector<56x1xf32> to vector<56x128xf32>
    %31 = arith.subf %0, %30 : vector<56x128xf32>
    %32 = math.exp %31 : vector<56x128xf32>
    %cst_7 = arith.constant dense<0.000000e+00> : vector<56x4xf32>
    %33 = tpu.matmul %32, %15, %cst_7 {dimension_numbers = #tpu.dot_dimension_numbers<[1], [0], [0], [1], [0, 0, 1, 1], [], []>} : vector<56x128xf32>, vector<128x4xf32>, vector<56x4xf32> -> vector<56x4xf32>
    %cst_8 = arith.constant dense<0.000000e+00> : vector<56x128xf32>
    %34 = tpu.matmul %3, %27, %cst_8 {dimension_numbers = #tpu.dot_dimension_numbers<[1], [0], [0], [1], [0, 0, 1, 1], [], []>} : vector<56x4xf32>, vector<4x128xf32>, vector<56x128xf32> -> vector<56x128xf32>
    %35 = tpu.iota {dimensions = array<i32: 1>} : vector<56x128xi32>
    %36 = arith.fptosi %34 : vector<56x128xf32> to vector<56x128xi32>
    %37 = arith.cmpi eq, %35, %36 : vector<56x128xi32>
    %cst_9 = arith.constant 0.000000e+00 : f32
    %38 = vector.broadcast %cst_9 : f32 to vector<56x128xf32>
    %39 = arith.select %37, %0, %38 : vector<56x128xi1>, vector<56x128xf32>
    %cst_10 = arith.constant dense<0.000000e+00> : vector<56x4xf32>
    %40 = tpu.matmul %39, %15, %cst_10 {dimension_numbers = #tpu.dot_dimension_numbers<[1], [0], [0], [1], [0, 0, 1, 1], [], []>} : vector<56x128xf32>, vector<128x4xf32>, vector<56x4xf32> -> vector<56x4xf32>
    %41 = vector.broadcast %29 : vector<56x1xf32> to vector<56x4xf32>
    %42 = arith.subf %40, %41 : vector<56x4xf32>
    %43 = math.log %33 : vector<56x4xf32>
    %44 = arith.subf %42, %43 : vector<56x4xf32>
    %cst_11 = arith.constant 0.699999988 : f32
    %45 = vector.broadcast %cst_11 : f32 to vector<56x4xf32>
    %46 = arith.mulf %45, %44 : vector<56x4xf32>
    %47 = math.exp %46 : vector<56x4xf32>
    %cst_12 = arith.constant 1.000000e+00 : f32
    %48 = vector.broadcast %cst_12 : f32 to vector<56x4xf32>
    %49 = arith.subf %48, %47 : vector<56x4xf32>
    %cst_13 = arith.constant 0.699999988 : f32
    %50 = vector.broadcast %cst_13 : f32 to vector<56x4xf32>
    %51 = arith.divf %49, %50 : vector<56x4xf32>
    %cst_14 = arith.constant 0.549182534 : f32
    %52 = vector.broadcast %cst_14 : f32 to vector<56x4xf32>
    %53 = arith.subf %51, %52 : vector<56x4xf32>
    %54 = arith.mulf %53, %2 : vector<56x4xf32>
    %cst_15 = arith.constant dense<0.000000e+00> : vector<4xf32>
    %55 = vector.multi_reduction <add>, %54, %cst_15 [0] : vector<56x4xf32> to vector<4xf32>
    %56 = vector.shape_cast %55 : vector<4xf32> to vector<1x4xf32>
    %57 = tpu.iota {dimensions = array<i32: 0>} : vector<8x4xi32>
    %c0_i32_16 = arith.constant 0 : i32
    %58 = vector.broadcast %c0_i32_16 : i32 to vector<8x4xi32>
    %59 = arith.cmpi eq, %57, %58 : vector<8x4xi32>
    %60 = arith.extui %59 : vector<8x4xi1> to vector<8x4xi32>
    %61 = arith.sitofp %60 : vector<8x4xi32> to vector<8x4xf32>
    %62 = vector.broadcast %56 : vector<1x4xf32> to vector<8x4xf32>
    %63 = arith.mulf %61, %62 : vector<8x4xf32>
    %c0_17 = arith.constant 0 : index
    %c0_18 = arith.constant 0 : index
    %c0_19 = arith.constant 0 : index
    %64 = vector.load %arg3[%c0_17, %c0_18, %c0_19] : memref<1x8x4xf32, #tpu.memory_space<vmem>>, vector<1x8x4xf32>
    %65 = vector.shape_cast %64 : vector<1x8x4xf32> to vector<8x4xf32>
    %66 = vector.shape_cast %63 : vector<8x4xf32> to vector<1x8x4xf32>
    tpu.vector_store %arg3[%c0_17, %c0_18, %c0_19], %66 {strides = array<i32>} : memref<1x8x4xf32, #tpu.memory_space<vmem>>, vector<1x8x4xf32>,
    return
  }
  func.func @transform_0(%arg0: i32) -> (i32, i32) {
    %c0_i32 = arith.constant 0 : i32
    %c0_i32_0 = arith.constant 0 : i32
    return %arg0, %c0_i32 : i32, i32
  }
  func.func @transform_1(%arg0: i32) -> (i32, i32) {
    %c0_i32 = arith.constant 0 : i32
    %c0_i32_0 = arith.constant 0 : i32
    return %arg0, %c0_i32 : i32, i32
  }
  func.func @transform_2(%arg0: i32) -> (i32, i32, i32) {
    %c0_i32 = arith.constant 0 : i32
    %c0_i32_0 = arith.constant 0 : i32
    %c0_i32_1 = arith.constant 0 : i32
    return %arg0, %c0_i32, %c0_i32_0 : i32, i32, i32
  }
}

</mosaic_0001>

<bundles_post_ra>
// kernel: tpu_custom_call.1
= control target key start
LH: loop header
LB: loop body
LE: loop exit
PB: predicated region body
PF: predicated region fallthrough
CT: control target
= control target key end

     0   :  { %v25_v0 = vlaneseq  ;;  %v1014_v3 = vmov 0.0   ;;  %vm1491_vm0 = vmmov 0   ;;  %s1016_s13 = smov 124   ;;  %vm319_vm3 = vcmask 1043456   ;;  %s1487_s1 = inlined_call_operand.vmem [shape: f32[56,8], index: 1, kind: input, shape index: {}]   ;;  %s1488_s0 = inlined_call_operand.vmem [shape: f32[56,128], index: 0, kind: input, shape index: {}]   ;;  %s1489_s2 = inlined_call_operand.vmem [shape: f32[1,8,4], index: 2, kind: output, shape index: {}]  }
   0x1   :  { %v1037_v1 = vld [vmem:[%s1487_s1] sm:$0xff]  ;;  %v1042_v2 = vld [vmem:[%s1487_s1 + $0x10] sm:$0xff]  ;;  %829 = vmatprep.subr.mxu1 %v1014_v3  ;;  %831 = vmatprep.mubr.msk.f32.mxu1 %vm1491_vm0, %v1014_v3  ;;  %v1056_v6 = vld [vmem:[%s1487_s1 + $0x8] sm:$0xff]  ;;  %v1017_v17 = vmov 0.0|0.0   ;;  %v1018_v31 = vmov 1.0|1.0  }
   0x2   :  { %290 = vrot.lane.b32.xlu0 %v1037_v1, %s1016_s13  ;;  %294 = vrot.lane.b32.xlu1 %v1042_v2, %s1016_s13  ;;  %v1049_v4 = vshrl.u32 %v25_v0, 7  ;;  %v1051_v5 = vand.u32 127, %v25_v0  ;;  %v1061_v7 = vld [vmem:[%s1487_s1 + $0x18] sm:$0xff]  ;;  %v1072_v10 = vld [vmem:[%s1487_s1 + $0x20] sm:$0xff]  ;;  %v1510_v32 = vmov 0  ;;  %v1512_v35 = vmov 0 }
   0x3   :  { %808 = vmatprep.mubr.msk.f32.mxu0 %vm1491_vm0, %v1014_v3  ;;  %v1077_v11 = vld [vmem:[%s1487_s1 + $0x28] sm:$0xff]  ;;  %v1088_v14 = vld [vmem:[%s1487_s1 + $0x30] sm:$0xff]  ;;  %905 = vmatprep.subr.bf16.mxu0 %v1017_v17  ;;  %v1514_v36 = vmov 0  ;;  %v1516_v37 = vmov 0  ;;  %v1518_v38 = vmov 0  ;;  %v1520_v39 = vmov 0 }
   0x4   :  { %v141_v8 = vmul.u32 32, %v1049_v4  ;;  %v1080_v12 = vmul.u32 32, %v1051_v5  ;;  %v27_v15 = vadd.s32 8, %v1049_v4  ;;  %v28_v18 = vadd.s32 16, %v1049_v4  ;;  %v1188_v40 = vld [vmem:[%s1488_s0 + $0x8] sm:$0xff]  ;;  %v1193_v41 = vld [vmem:[%s1488_s0] sm:$0xff] }
   0x5   :  { %v29_v19 = vadd.s32 24, %v1049_v4  ;;  %v30_v20 = vadd.s32 32, %v1049_v4  ;;  %v31_v22 = vadd.s32 40, %v1049_v4  ;;  %v32_v27 = vadd.s32 48, %v1049_v4  ;;  %v1200_v42 = vld [vmem:[%s1488_s0 + $0x10] sm:$0xff]  ;;  %v1205_v43 = vld [vmem:[%s1488_s0 + $0x18] sm:$0xff] }
   0x6   :  { %292 = vrot.lane.b32.xlu0 %v1056_v6, %s1016_s13  ;;  %296 = vrot.lane.b32.xlu1 %v1061_v7, %s1016_s13  ;;  %v142_v9 = vsub.s32 %v1051_v5, %v141_v8  ;;  %v45_v16 = vsub.s32 %v1049_v4, %v1080_v12  ;;  %v46_v21 = vsub.s32 %v27_v15, %v1080_v12  ;;  %v33_v29 = vadd.s32 56, %v1049_v4  ;;  %v1212_v44 = vld [vmem:[%s1488_s0 + $0x20] sm:$0xff]  ;;  %v1217_v45 = vld [vmem:[%s1488_s0 + $0x28] sm:$0xff] }
   0x7   :  { %v47_v24 = vsub.s32 %v28_v18, %v1080_v12  ;;  %v48_v25 = vsub.s32 %v29_v19, %v1080_v12  ;;  %v49_v26 = vsub.s32 %v30_v20, %v1080_v12  ;;  %v50_v28 = vsub.s32 %v31_v22, %v1080_v12  ;;  %v1224_v46 = vld [vmem:[%s1488_s0 + $0x30] sm:$0xff] }
   0x8   :  { %vm143_vm1 = vcmp.ge.s32.totalorder %v142_v9, 0  ;;  %vm144_vm2 = vcmp.lt.s32.totalorder %v142_v9, 32  ;;  %vm61_vm5 = vcmp.ge.s32.totalorder %v45_v16, 0  ;;  %vm77_vm6 = vcmp.lt.s32.totalorder %v45_v16, 32 }
   0x9   :  { %vm145_vm4 = vmand %vm143_vm1, %vm144_vm2  ;;  %vm62_vm8 = vcmp.ge.s32.totalorder %v46_v21, 0  ;;  %vm78_vm9 = vcmp.lt.s32.totalorder %v46_v21, 32  ;;  %vm63_vm11 = vcmp.ge.s32.totalorder %v47_v24, 0  ;;  %vm64_vm12 = vcmp.ge.s32.totalorder %v48_v25, 0 }
   0xa   :  { %298 = vrot.lane.b32.xlu0 %v1072_v10, %s1016_s13  ;;  %300 = vrot.lane.b32.xlu1 %v1077_v11, %s1016_s13  ;;  %v666_v13 = vsel %vm145_vm4, 1.0, %v1014_v3  ;;  %vm1101_vm7 = vmand %vm61_vm5, %vm77_vm6  ;;  %vm79_vm13 = vcmp.lt.s32.totalorder %v47_v24, 32  ;;  %vm80_vm14 = vcmp.lt.s32.totalorder %v48_v25, 32  ;;  %vm65_vm2 = vcmp.ge.s32.totalorder %v49_v26, 0 }
   0xb   :  { %830 = vmatpush3.msk.msra.mxu1 %vm319_vm3, %v666_v13  ;;  %vm1111_vm10 = vmand %vm62_vm8, %vm78_vm9  ;;  %vm81_vm3 = vcmp.lt.s32.totalorder %v49_v26, 32  ;;  %v51_v33 = vsub.s32 %v32_v27, %v1080_v12  ;;  %v52_v34 = vsub.s32 %v33_v29, %v1080_v12  ;;  %vm66_vm5 = vcmp.ge.s32.totalorder %v50_v28, 0 }
   0xc   :  { %929 = vmatprep.subr.bf16.mxu1 %v1017_v17  ;;  %vm1490_vm15 = vmpackc.low %vm1111_vm10, %vm1101_vm7  ;;  %vm82_vm6 = vcmp.lt.s32.totalorder %v50_v28, 32  ;;  %v34_v47 = vadd.s32 64, %v1049_v4  ;;  %v35_v48 = vadd.s32 72, %v1049_v4  ;;  %v36_v49 = vadd.s32 80, %v1049_v4 }
   0xd   :  { %907 = vmatpush3.bf16.msk.msra.mxu0 %vm1490_vm15, %v1018_v31  ;;  %vm1125_vm1 = vmand %vm63_vm11, %vm79_vm13  ;;  %vm67_vm11 = vcmp.ge.s32.totalorder %v51_v33, 0  ;;  %vm83_vm13 = vcmp.lt.s32.totalorder %v51_v33, 32  ;;  %vm84_vm15 = vcmp.lt.s32.totalorder %v52_v34, 32  ;;  %v37_v50 = vadd.s32 88, %v1049_v4 }
   0xe   :  { %302 = vrot.lane.b32.xlu0 %v1088_v14, %s1016_s13  ;;  %v1511_v32 = vsel %vm1125_vm1, 4294967295, %v1510_v32  ;;  %908 = vmatprep.subr.bf16.mxu0 %v1017_v17  ;;  %vm1132_vm4 = vmand %vm64_vm12, %vm80_vm14  ;;  %vm68_vm14 = vcmp.ge.s32.totalorder %v52_v34, 0  ;;  %v53_v51 = vsub.s32 %v34_v47, %v1080_v12  ;;  %v54_v52 = vsub.s32 %v35_v48, %v1080_v12 }
   0xf   :  { %v1513_v35 = vsel %vm1132_vm4, 4294967295, %v1512_v35  ;;  %vm1495_vm8 = vmpackc.low %vm1132_vm4, %vm1125_vm1  ;;  %v55_v53 = vsub.s32 %v36_v49, %v1080_v12  ;;  %v56_v54 = vsub.s32 %v37_v50, %v1080_v12  ;;  %v38_v55 = vadd.s32 96, %v1049_v4 }
  0x10   :  { %vm1140_vm9 = vmand %vm65_vm2, %vm81_vm3  ;;  %v39_v56 = vadd.s32 104, %v1049_v4  ;;  %v1522_v57 = vmov 0  ;;  %v1524_v58 = vmov 0  ;;  %v40_v61 = vadd.s32 112, %v1049_v4 }
  0x11   :  { %v1515_v36 = vsel %vm1140_vm9, 4294967295, %v1514_v36  ;;  %910 = vmatpush3.bf16.msk.msra.mxu0 %vm1495_vm8, %v1018_v31  ;;  %vm1150_vm12 = vmand %vm66_vm5, %vm82_vm6  ;;  %vm70_vm6 = vcmp.ge.s32.totalorder %v54_v52, 0  ;;  %vm87_vm8 = vcmp.lt.s32.totalorder %v55_v53, 32  ;;  %v57_v59 = vsub.s32 %v38_v55, %v1080_v12 }
  0x12   :  { %v1517_v37 = vsel %vm1150_vm12, 4294967295, %v1516_v37  ;;  %911 = vmatprep.subr.bf16.mxu0 %v1017_v17  ;;  %vm1494_vm2 = vmpackc.low %vm1150_vm12, %vm1140_vm9  ;;  %v58_v60 = vsub.s32 %v39_v56, %v1080_v12  ;;  %v41_v62 = vadd.s32 120, %v1049_v4  ;;  %v59_v8 = vsub.s32 %v40_v61, %v1080_v12 }
  0x13   :  { %vm1159_vm3 = vmand %vm67_vm11, %vm83_vm13  ;;  %vm85_vm11 = vcmp.lt.s32.totalorder %v53_v51, 32  ;;  %vm86_vm13 = vcmp.lt.s32.totalorder %v54_v52, 32 }
  0x14   :  { %v1519_v38 = vsel %vm1159_vm3, 4294967295, %v1518_v38  ;;  %vm1163_vm0 = vmand %vm68_vm14, %vm84_vm15  ;;  %vm69_vm15 = vcmp.ge.s32.totalorder %v53_v51, 0  ;;  %vm74_vm12 = vcmp.ge.s32.totalorder %v58_v60, 0  ;;  %vm90_vm1 = vcmp.lt.s32.totalorder %v58_v60, 32 }
  0x15   :  { %v1521_v39 = vsel %vm1163_vm0, 4294967295, %v1520_v39  ;;  %913 = vmatpush3.bf16.msk.msra.mxu0 %vm1494_vm2, %v1018_v31  ;;  %vm1493_vm5 = vmpackc.low %vm1163_vm0, %vm1159_vm3  ;;  %vm72_vm2 = vcmp.ge.s32.totalorder %v56_v54, 0  ;;  %vm88_vm3 = vcmp.lt.s32.totalorder %v56_v54, 32  ;;  %v60_v9 = vsub.s32 %v41_v62, %v1080_v12 }
  0x16   :  { %914 = vmatprep.subr.bf16.mxu0 %v1017_v17  ;;  %vm1237_vm14 = vmand %vm69_vm15, %vm85_vm11  ;;  %vm73_vm11 = vcmp.ge.s32.totalorder %v57_v59, 0 }
  0x17   :  { %v1523_v57 = vsel %vm1237_vm14, 4294967295, %v1522_v57  ;;  %vm1241_vm0 = vmand %vm70_vm6, %vm86_vm13  ;;  %vm89_vm13 = vcmp.lt.s32.totalorder %v57_v59, 32 }
  0x18   :  { %v1525_v58 = vsel %vm1241_vm0, 4294967295, %v1524_v58  ;;  %vm1501_vm15 = vmpackc.low %vm1241_vm0, %vm1237_vm14  ;;  %vm76_vm14 = vcmp.ge.s32.totalorder %v60_v9, 0  ;;  %vm92_vm0 = vcmp.lt.s32.totalorder %v60_v9, 32 }
  0x19   :  { %916 = vmatpush3.bf16.msk.msra.mxu0 %vm1493_vm5, %v1018_v31  ;;  %vm71_vm5 = vcmp.ge.s32.totalorder %v55_v53, 0  ;;  %vm1264_vm9 = vmand %vm72_vm2, %vm88_vm3  ;;  %vm91_vm2 = vcmp.lt.s32.totalorder %v59_v8, 32 }
  0x1a   :  { %917 = vmatprep.subr.bf16.mxu0 %v1017_v17  ;;  %vm1259_vm6 = vmand %vm71_vm5, %vm87_vm8 }
  0x1b   :  { %vm921_vm8 = vmpackc.low %vm1264_vm9, %vm1259_vm6 }
  0x1c   :  { %vm1274_vm5 = vmand %vm73_vm11, %vm89_vm13 }
  0x1d   :  { %919 = vmatpush3.bf16.msk.msra.mxu0 %vm1501_vm15, %v1018_v31  ;;  %vm75_vm15 = vcmp.ge.s32.totalorder %v59_v8, 0  ;;  %vm1284_vm3 = vmand %vm74_vm12, %vm90_vm1  ;;  %vm1538_vm12 = vmmov 0  }
  0x1e   :  { %920 = vmatprep.subr.bf16.mxu0 %v1017_v17  ;;  %vm924_vm11 = vmpackc.low %vm1284_vm3, %vm1274_vm5 }
  0x1f   :  { %vm1293_vm13 = vmand %vm75_vm15, %vm91_vm2  ;;  %vm1540_vm15 = vnez %v1513_v35  ;;  %vm1541_vm2 = vnez %v1511_v32 }
  0x20   :  { %vm1297_vm4 = vmand %vm76_vm14, %vm92_vm0  ;;  %vm304_vm0 = vcmask 31744  }
  0x21   :  { %922 = vmatpush3.bf16.msk.msra.mxu0 %vm921_vm8, %v1018_v31  ;;  %vm1505_vm1 = vmpackc.low %vm1297_vm4, %vm1293_vm13 }
  0x22   :  { %923 = vmatprep.subr.bf16.mxu0 %v1017_v17  ;;  %vm1539_vm14 = vmpackc.low %vm1111_vm10, %vm1101_vm7  ;;  %vm1543_vm7 = vnez %v1517_v37  ;;  %vm1544_vm10 = vnez %v1515_v36 }
  0x23   :  { %vm1552_vm9 = vmpackc.low %vm1297_vm4, %vm1293_vm13 }
  0x25   :  { %925 = vmatpush3.bf16.msk.msra.mxu0 %vm924_vm11, %v1018_v31 }
  0x26   :  { %926 = vmatprep.subr.bf16.mxu0 %v1017_v17 }
  0x29   :  { %928 = vmatpush3.bf16.msk.msra.mxu0 %vm1505_vm1, %v1018_v31  ;;  %vm1542_vm1 = vmpackc.low %vm1540_vm15, %vm1541_vm2  ;;  %vm1547_vm15 = vnez %v1519_v38 }
  0x2d   :  { %150 = vmax.xlane.f32.xlu0 %v1188_v40 }
  0x2e   :  { %148 = vmax.xlane.f32.xlu1 %v1193_v41 }
  0x31   :  { %152 = vmax.xlane.f32.xlu0 %v1200_v42 }
  0x32   :  { %154 = vmax.xlane.f32.xlu1 %v1205_v43 }
  0x35   :  { %156 = vmax.xlane.f32.xlu0 %v1212_v44 }
  0x36   :  { %158 = vmax.xlane.f32.xlu1 %v1217_v45 }
  0x39   :  { %160 = vmax.xlane.f32.xlu0 %v1224_v46 }
  0x74   :  { %v291_v18 = vpop.permute.xlu0 %290  ;;  %v295_v20 = vpop.permute.xlu1 %294 }
  0x75   :  { %832 = vmatmul.mubr.msk.f32.vlgmr.msra.gmra.mrb[0].mxu1 %vm304_vm0, %v291_v18 }
  0x76   :  { %834 = vmatprep.mubr.msk.f32.mxu1 %vm1538_vm12, %v1014_v3  ;;  %931 = vmatpush3.bf16.msk.msra.mxu1 %vm1539_vm14, %v1018_v31  ;;  %vm1545_vm14 = vmpackc.low %vm1543_vm7, %vm1544_vm10  ;;  %vm1549_vm7 = vnez %v1525_v58  ;;  %vm1550_vm10 = vnez %v1523_v57 }
  0x77   :  { %932 = vmatprep.subr.bf16.mxu1 %v1017_v17 }
  0x78   :  { %v293_v19 = vpop.permute.xlu0 %292  ;;  %v297_v21 = vpop.permute.xlu1 %296 }
  0x79   :  { %835 = vmatmul.mubr.msk.f32.gmra.mrb[2].mxu1 %vm304_vm0, %v293_v19 }
  0x7a   :  { %837 = vmatprep.mubr.msk.f32.mxu1 %vm1538_vm12, %v1014_v3  ;;  %934 = vmatpush3.bf16.msk.msra.mxu1 %vm1542_vm1, %v1018_v31  ;;  %vm1546_vm1 = vnez %v1521_v39 }
  0x7b   :  { %935 = vmatprep.subr.bf16.mxu1 %v1017_v17  ;;  %vm1548_vm2 = vmpackc.low %vm1546_vm1, %vm1547_vm15 }
  0x7c   :  { %v299_v22 = vpop.permute.xlu0 %298  ;;  %v301_v23 = vpop.permute.xlu1 %300 }
  0x7d   :  { %838 = vmatmul.mubr.msk.f32.gmra.mrb[4].mxu1 %vm304_vm0, %v295_v20 }
  0x7e   :  { %840 = vmatprep.mubr.msk.f32.mxu1 %vm1538_vm12, %v1014_v3  ;;  %937 = vmatpush3.bf16.msk.msra.mxu1 %vm1545_vm14, %v1018_v31  ;;  %vm1551_vm14 = vmpackc.low %vm1549_vm7, %vm1550_vm10 }
  0x7f   :  { %938 = vmatprep.subr.bf16.mxu1 %v1017_v17 }
  0x80   :  { %v303_v24 = vpop.permute.xlu0 %302 }
  0x81   :  { %841 = vmatmul.mubr.msk.f32.gmra.mrb[6].mxu1 %vm304_vm0, %v297_v21 }
  0x82   :  { %843 = vmatprep.mubr.msk.f32.mxu1 %vm1538_vm12, %v1014_v3  ;;  %940 = vmatpush3.bf16.msk.msra.mxu1 %vm1548_vm2, %v1018_v31 }
  0x83   :  { %941 = vmatprep.subr.bf16.mxu1 %v1017_v17 }
  0x85   :  { %844 = vmatmul.mubr.msk.f32.gmra.mrb[8].mxu1 %vm304_vm0, %v299_v22 }
  0x86   :  { %846 = vmatprep.mubr.msk.f32.mxu1 %vm1538_vm12, %v1014_v3  ;;  %943 = vmatpush3.bf16.msk.msra.mxu1 %vm1551_vm14, %v1018_v31 }
  0x87   :  { %944 = vmatprep.subr.bf16.mxu1 %v1017_v17 }
  0x89   :  { %847 = vmatmul.mubr.msk.f32.gmra.mrb[10].mxu1 %vm304_vm0, %v301_v23 }
  0x8a   :  { %849 = vmatprep.mubr.msk.f32.mxu1 %vm1538_vm12, %v1014_v3  ;;  %946 = vmatpush3.bf16.msk.msra.mxu1 %vm921_vm8, %v1018_v31 }
  0x8b   :  { %947 = vmatprep.subr.bf16.mxu1 %v1017_v17 }
  0x8d   :  { %850 = vmatmul.mubr.msk.f32.gmra.mrb[12].mxu1 %vm304_vm0, %v303_v24 }
  0x8e   :  { %949 = vmatpush3.bf16.msk.msra.mxu1 %vm924_vm11, %v1018_v31  ;;  %884 = vmatprep.mubr.msk.f32.mxu1 %vm1538_vm12, %v1014_v3 }
  0x8f   :  { %950 = vmatprep.subr.bf16.mxu1 %v1017_v17 }
  0x92   :  { %952 = vmatpush3.bf16.msk.msra.mxu1 %vm1552_vm9, %v1018_v31 }
  0xba   :  { %v1394_v25 = vpop.xlane.xlu0 %150 }
  0xbb   :  { %v1396_v26 = vpop.xlane.xlu1 %148  ;;  %v163_v27 = vsub.f32 %v1188_v40, %v1394_v25 }
  0xbc   :  { %v162_v28 = vsub.f32 %v1193_v41, %v1396_v26 }
  0xbd   :  { %v171_v30 = vmul.f32 1.442695, %v163_v27 }
  0xbe   :  { %v169_v29 = vmul.f32 1.442695, %v162_v28  ;;  %v1402_v17 = vpop.xlane.xlu0 %152 }
  0xbf   :  { %v164_v32 = vsub.f32 %v1200_v42, %v1402_v17  ;;  %v1406_v33 = vpop.xlane.xlu1 %154 }
  0xc0   :  { %972 = vpow2.f32 %v169_v29  ;;  %v165_v34 = vsub.f32 %v1205_v43, %v1406_v33 }
  0xc1   :  { %974 = vpow2.f32 %v171_v30  ;;  %v173_v31 = vmul.f32 1.442695, %v164_v32 }
  0xc2   :  { %v1410_v35 = vpop.xlane.xlu0 %156  ;;  %v175_v36 = vmul.f32 1.442695, %v165_v34 }
  0xc3   :  { %976 = vpow2.f32 %v173_v31  ;;  %v166_v37 = vsub.f32 %v1212_v44, %v1410_v35  ;;  %v1414_v38 = vpop.xlane.xlu1 %158 }
  0xc4   :  { %978 = vpow2.f32 %v175_v36  ;;  %v167_v48 = vsub.f32 %v1217_v45, %v1414_v38 }
  0xc5   :  { %v177_v47 = vmul.f32 1.442695, %v166_v37 }
  0xc6   :  { %v1418_v49 = vpop.xlane.xlu0 %160  ;;  %v179_v51 = vmul.f32 1.442695, %v167_v48 }
  0xc7   :  { %980 = vpow2.f32 %v177_v47  ;;  %v168_v52 = vsub.f32 %v1224_v46, %v1418_v49 }
  0xc8   :  { %982 = vpow2.f32 %v179_v51 }
  0xc9   :  { %v181_v54 = vmul.f32 1.442695, %v168_v52 }
  0xca   :  { %v973_v39 = vpop.eup %972 }
  0xcb   :  { %809 = vmatmul.mubr.f32.vlgmr.msra.gmra.mrb[0].mxu0 %v973_v39  ;;  %v975_v50 = vpop.eup %974  ;;  %984 = vpow2.f32 %v181_v54 }
  0xcc   :  { %811 = vmatprep.mubr.msk.f32.mxu0 %vm1538_vm12, %v1014_v3 }
  0xcd   :  { %v977_v53 = vpop.eup %976 }
  0xce   :  { %v979_v55 = vpop.eup %978 }
  0xcf   :  { %812 = vmatmul.mubr.f32.gmra.mrb[2].mxu0 %v975_v50 }
  0xd0   :  { %814 = vmatprep.mubr.msk.f32.mxu0 %vm1538_vm12, %v1014_v3 }
  0xd1   :  { %v981_v56 = vpop.eup %980 }
  0xd2   :  { %v983_v57 = vpop.eup %982 }
  0xd3   :  { %815 = vmatmul.mubr.f32.gmra.mrb[4].mxu0 %v977_v53 }
  0xd4   :  { %817 = vmatprep.mubr.msk.f32.mxu0 %vm1538_vm12, %v1014_v3 }
  0xd5   :  { %v985_v58 = vpop.eup %984 }
  0xd7   :  { %818 = vmatmul.mubr.f32.gmra.mrb[6].mxu0 %v979_v55 }
  0xd8   :  { %820 = vmatprep.mubr.msk.f32.mxu0 %vm1538_vm12, %v1014_v3 }
  0xdb   :  { %821 = vmatmul.mubr.f32.gmra.mrb[8].mxu0 %v981_v56 }
  0xdc   :  { %823 = vmatprep.mubr.msk.f32.mxu0 %vm1538_vm12, %v1014_v3 }
  0xdf   :  { %824 = vmatmul.mubr.f32.gmra.mrb[10].mxu0 %v983_v57 }
  0xe0   :  { %826 = vmatprep.mubr.msk.f32.mxu0 %vm1538_vm12, %v1014_v3 }
  0xe3   :  { %827 = vmatmul.mubr.f32.gmra.mrb[12].mxu0 %v985_v58 }
 0x148   :  { %v389_v59 = vpop.f32.mrb[0].mxu1 }
 0x149   :  { %v953_v60 = vtrunc.f32 %v389_v59  ;;  %v833_v61 = vpop.f32.mrb[1].mxu1 }
 0x14b   :  { %v954_v62 = vcvt.f32.s32 %v953_v60 }
 0x14c   :  { %v394_v63 = vpop.f32.mrb[2].mxu1 }
 0x14d   :  { %vm430_vm4 = vcmp.eq.s32.totalorder %v1051_v5, %v954_v62  ;;  %v955_v0 = vtrunc.f32 %v394_v63  ;;  %v836_v8 = vpop.f32.mrb[3].mxu1 }
 0x14e   :  { %885 = vmatmul.mubr.msk.f32.vlgmr.msra.gmra.mrb[14].mxu1 %vm430_vm4, %v1193_v41 }
 0x14f   :  { %v956_v9 = vcvt.f32.s32 %v955_v0  ;;  %887 = vmatprep.mubr.msk.f32.mxu1 %vm1538_vm12, %v1014_v3 }
 0x150   :  { %v399_v13 = vpop.f32.mrb[4].mxu1 }
 0x151   :  { %vm431_vm6 = vcmp.eq.s32.totalorder %v1051_v5, %v956_v9  ;;  %v957_v12 = vtrunc.f32 %v399_v13  ;;  %v839_v15 = vpop.f32.mrb[5].mxu1 }
 0x152   :  { %888 = vmatmul.mubr.msk.f32.gmra.mrb[16].mxu1 %vm431_vm6, %v1188_v40 }
 0x153   :  { %v958_v16 = vcvt.f32.s32 %v957_v12  ;;  %890 = vmatprep.mubr.msk.f32.mxu1 %vm1538_vm12, %v1014_v3 }
 0x154   :  { %v404_v18 = vpop.f32.mrb[6].mxu1 }
 0x155   :  { %vm432_vm8 = vcmp.eq.s32.totalorder %v1051_v5, %v958_v16  ;;  %v959_v19 = vtrunc.f32 %v404_v18  ;;  %v842_v41 = vpop.f32.mrb[7].mxu1 }
 0x156   :  { %891 = vmatmul.mubr.msk.f32.gmra.mrb[18].mxu1 %vm432_vm8, %v1200_v42 }
 0x157   :  { %v960_v20 = vcvt.f32.s32 %v959_v19  ;;  %893 = vmatprep.mubr.msk.f32.mxu1 %vm1538_vm12, %v1014_v3 }
 0x158   :  { %v409_v21 = vpop.f32.mrb[8].mxu1 }
 0x159   :  { %vm433_vm5 = vcmp.eq.s32.totalorder %v1051_v5, %v960_v20  ;;  %v961_v22 = vtrunc.f32 %v409_v21  ;;  %v845_v40 = vpop.f32.mrb[9].mxu1 }
 0x15a   :  { %894 = vmatmul.mubr.msk.f32.gmra.mrb[20].mxu1 %vm433_vm5, %v1205_v43 }
 0x15b   :  { %v962_v23 = vcvt.f32.s32 %v961_v22  ;;  %896 = vmatprep.mubr.msk.f32.mxu1 %vm1538_vm12, %v1014_v3 }
 0x15c   :  { %v414_v24 = vpop.f32.mrb[10].mxu1 }
 0x15d   :  { %vm434_vm3 = vcmp.eq.s32.totalorder %v1051_v5, %v962_v23  ;;  %v963_v27 = vtrunc.f32 %v414_v24  ;;  %v848_v42 = vpop.f32.mrb[11].mxu1 }
 0x15e   :  { %897 = vmatmul.mubr.msk.f32.gmra.mrb[22].mxu1 %vm434_vm3, %v1212_v44 }
 0x15f   :  { %v964_v28 = vcvt.f32.s32 %v963_v27  ;;  %899 = vmatprep.mubr.msk.f32.mxu1 %vm1538_vm12, %v1014_v3 }
 0x160   :  { %v419_v29 = vpop.f32.mrb[12].mxu1 }
 0x161   :  { %vm435_vm11 = vcmp.eq.s32.totalorder %v1051_v5, %v964_v28  ;;  %v965_v30 = vtrunc.f32 %v419_v29  ;;  %v851_v43 = vpop.f32.mrb[13].mxu1 }
 0x162   :  { %900 = vmatmul.mubr.msk.f32.gmra.mrb[24].mxu1 %vm435_vm11, %v1217_v45 }
 0x163   :  { %v966_v32 = vcvt.f32.s32 %v965_v30  ;;  %902 = vmatprep.mubr.msk.f32.mxu1 %vm1538_vm12, %v1014_v3  ;;  %vm641_vm12 = vcmp.eq.s32.totalorder %v1049_v4, 0 }
 0x165   :  { %vm436_vm13 = vcmp.eq.s32.totalorder %v1051_v5, %v966_v32 }
 0x166   :  { %903 = vmatmul.mubr.msk.f32.gmra.mrb[26].mxu1 %vm436_vm13, %v1224_v46 }
 0x19e   :  { %v249_v44 = vpop.f32.mrb[0].mxu0 }
 0x19f   :  { %v810_v31 = vpop.f32.mrb[1].mxu0  ;;  %986 = vlog2.f32 %v249_v44 }
 0x1a2   :  { %v254_v34 = vpop.f32.mrb[2].mxu0 }
 0x1a3   :  { %v813_v36 = vpop.f32.mrb[3].mxu0  ;;  %988 = vlog2.f32 %v254_v34 }
 0x1a6   :  { %v259_v37 = vpop.f32.mrb[4].mxu0 }
 0x1a7   :  { %v816_v39 = vpop.f32.mrb[5].mxu0  ;;  %990 = vlog2.f32 %v259_v37 }
 0x1a9   :  { %v987_v5 = vpop.eup %986 }
 0x1aa   :  { %v264_v47 = vpop.f32.mrb[6].mxu0  ;;  %v552_v46 = vmul.f32 0.6931472, %v987_v5 }
 0x1ab   :  { %v819_v48 = vpop.f32.mrb[7].mxu0  ;;  %992 = vlog2.f32 %v264_v47 }
 0x1ad   :  { %v989_v55 = vpop.eup %988 }
 0x1ae   :  { %v269_v50 = vpop.f32.mrb[8].mxu0  ;;  %v554_v59 = vmul.f32 0.6931472, %v989_v55 }
 0x1af   :  { %v822_v51 = vpop.f32.mrb[9].mxu0  ;;  %994 = vlog2.f32 %v269_v50 }
 0x1b1   :  { %v991_v61 = vpop.eup %990 }
 0x1b2   :  { %v274_v52 = vpop.f32.mrb[10].mxu0  ;;  %v556_v9 = vmul.f32 0.6931472, %v991_v61 }
 0x1b3   :  { %v825_v45 = vpop.f32.mrb[11].mxu0  ;;  %996 = vlog2.f32 %v274_v52 }
 0x1b5   :  { %v993_v15 = vpop.eup %992 }
 0x1b6   :  { %v279_v53 = vpop.f32.mrb[12].mxu0  ;;  %v558_v41 = vmul.f32 0.6931472, %v993_v15 }
 0x1b7   :  { %v828_v54 = vpop.f32.mrb[13].mxu0 }
 0x1b9   :  { %v995_v22 = vpop.eup %994 }
 0x1ba   :  { %v560_v27 = vmul.f32 0.6931472, %v995_v22 }
 0x1bd   :  { %v997_v29 = vpop.eup %996 }
 0x1be   :  { %v562_v31 = vmul.f32 0.6931472, %v997_v29 }
 0x221   :  { %v510_v56 = vpop.f32.mrb[14].mxu1 }
 0x222   :  { %v544_v57 = vsub.f32 %v510_v56, %v1396_v26  ;;  %v886_v58 = vpop.f32.mrb[15].mxu1 }
 0x224   :  { %v565_v60 = vsub.f32 %v544_v57, %v552_v46 }
 0x225   :  { %v515_v62 = vpop.f32.mrb[16].mxu1 }
 0x226   :  { %v572_v63 = vmul.f32 0.7, %v565_v60  ;;  %v545_v0 = vsub.f32 %v515_v62, %v1394_v25  ;;  %v889_v8 = vpop.f32.mrb[17].mxu1 }
 0x228   :  { %v579_v13 = vmul.f32 1.442695, %v572_v63  ;;  %v566_v12 = vsub.f32 %v545_v0, %v554_v59 }
 0x229   :  { %v520_v16 = vpop.f32.mrb[18].mxu1 }
 0x22a   :  { %998 = vpow2.f32 %v579_v13  ;;  %v573_v18 = vmul.f32 0.7, %v566_v12  ;;  %v546_v26 = vsub.f32 %v520_v16, %v1402_v17  ;;  %v892_v19 = vpop.f32.mrb[19].mxu1 }
 0x22b   :  { %1000 = vlog2.f32 %v279_v53 }
 0x22c   :  { %v581_v20 = vmul.f32 1.442695, %v573_v18  ;;  %v567_v21 = vsub.f32 %v546_v26, %v556_v9 }
 0x22d   :  { %v525_v40 = vpop.f32.mrb[20].mxu1 }
 0x22e   :  { %1002 = vpow2.f32 %v581_v20  ;;  %v574_v25 = vmul.f32 0.7, %v567_v21  ;;  %v547_v23 = vsub.f32 %v525_v40, %v1406_v33  ;;  %v895_v24 = vpop.f32.mrb[21].mxu1 }
 0x230   :  { %v583_v42 = vmul.f32 1.442695, %v574_v25  ;;  %v568_v28 = vsub.f32 %v547_v23, %v558_v41 }
 0x231   :  { %v530_v30 = vpop.f32.mrb[22].mxu1 }
 0x232   :  { %1004 = vpow2.f32 %v583_v42  ;;  %v575_v43 = vmul.f32 0.7, %v568_v28  ;;  %v548_v17 = vsub.f32 %v530_v30, %v1410_v35  ;;  %v898_v32 = vpop.f32.mrb[23].mxu1 }
 0x234   :  { %v999_v44 = vpop.eup %998  ;;  %v585_v34 = vmul.f32 1.442695, %v575_v43  ;;  %v569_v36 = vsub.f32 %v548_v17, %v560_v27 }
 0x235   :  { %v1001_v37 = vpop.eup %1000  ;;  %v593_v39 = vsub.f32 1.0, %v999_v44  ;;  %v535_v47 = vpop.f32.mrb[24].mxu1 }
 0x236   :  { %1006 = vpow2.f32 %v585_v34  ;;  %v576_v33 = vmul.f32 0.7, %v569_v36  ;;  %v549_v48 = vsub.f32 %v535_v47, %v1414_v38  ;;  %v901_v50 = vpop.f32.mrb[25].mxu1  ;;  %v564_v45 = vmul.f32 0.6931472, %v1001_v37 }
 0x237   :  { %v601_v51 = vmul.f32 1.4285715, %v593_v39 }
 0x238   :  { %v1003_v52 = vpop.eup %1002  ;;  %v587_v53 = vmul.f32 1.442695, %v576_v33  ;;  %v570_v54 = vsub.f32 %v549_v48, %v562_v31 }
 0x239   :  { %v714_v5 = vadd.f32 -0.54918253, %v601_v51  ;;  %v594_v35 = vsub.f32 1.0, %v1003_v52  ;;  %v540_v46 = vpop.f32.mrb[26].mxu1 }
 0x23a   :  { %1008 = vpow2.f32 %v587_v53  ;;  %v577_v55 = vmul.f32 0.7, %v570_v54  ;;  %v550_v56 = vsub.f32 %v540_v46, %v1418_v49  ;;  %v904_v57 = vpop.f32.mrb[27].mxu1 }
 0x23b   :  { %v602_v58 = vmul.f32 1.4285715, %v594_v35  ;;  %v615_v38 = vmul.f32 %v714_v5, %v1037_v1 }
 0x23c   :  { %v1005_v59 = vpop.eup %1004  ;;  %v589_v60 = vmul.f32 1.442695, %v577_v55  ;;  %v571_v61 = vsub.f32 %v550_v56, %v564_v45  ;;  %v721_v45 = vsel %vm641_vm12, 1.0, %v1014_v3 }
 0x23d   :  { %v715_v62 = vadd.f32 -0.54918253, %v602_v58  ;;  %v595_v63 = vsub.f32 1.0, %v1005_v59  ;;  %v622_v15 = vsel %vm304_vm0, %v615_v38, 0.0 }
 0x23e   :  { %1010 = vpow2.f32 %v589_v60  ;;  %v578_v0 = vmul.f32 0.7, %v571_v61 }
 0x23f   :  { %v616_v8 = vmul.f32 %v715_v62, %v1056_v6  ;;  %v603_v9 = vmul.f32 1.4285715, %v595_v63 }
 0x240   :  { %v1007_v13 = vpop.eup %1006  ;;  %v591_v12 = vmul.f32 1.442695, %v578_v0 }
 0x241   :  { %v623_v49 = vsel %vm304_vm0, %v616_v8, 0.0  ;;  %v716_v16 = vadd.f32 -0.54918253, %v603_v9  ;;  %v596_v18 = vsub.f32 1.0, %v1007_v13 }
 0x242   :  { %v624_v26 = vadd.f32 %v623_v49, %v622_v15  ;;  %1012 = vpow2.f32 %v591_v12 }
 0x243   :  { %v617_v19 = vmul.f32 %v716_v16, %v1042_v2  ;;  %v604_v1 = vmul.f32 1.4285715, %v596_v18 }
 0x244   :  { %v1009_v41 = vpop.eup %1008 }
 0x245   :  { %v625_v20 = vsel %vm304_vm0, %v617_v19, 0.0  ;;  %v717_v21 = vadd.f32 -0.54918253, %v604_v1  ;;  %v597_v22 = vsub.f32 1.0, %v1009_v41 }
 0x246   :  { %v626_v6 = vadd.f32 %v625_v20, %v624_v26 }
 0x247   :  { %v618_v40 = vmul.f32 %v717_v21, %v1061_v7  ;;  %v605_v25 = vmul.f32 1.4285715, %v597_v22 }
 0x248   :  { %v1011_v23 = vpop.eup %1010 }
 0x249   :  { %v627_v24 = vsel %vm304_vm0, %v618_v40, 0.0  ;;  %v718_v27 = vadd.f32 -0.54918253, %v605_v25  ;;  %v598_v42 = vsub.f32 1.0, %v1011_v23 }
 0x24a   :  { %v628_v28 = vadd.f32 %v627_v24, %v626_v6 }
 0x24b   :  { %v619_v29 = vmul.f32 %v718_v27, %v1072_v10  ;;  %v606_v30 = vmul.f32 1.4285715, %v598_v42 }
 0x24c   :  { %v1013_v2 = vpop.eup %1012 }
 0x24d   :  { %v629_v43 = vsel %vm304_vm0, %v619_v29, 0.0  ;;  %v719_v17 = vadd.f32 -0.54918253, %v606_v30  ;;  %v599_v32 = vsub.f32 1.0, %v1013_v2 }
 0x24e   :  { %v630_v44 = vadd.f32 %v629_v43, %v628_v28 }
 0x24f   :  { %v620_v31 = vmul.f32 %v719_v17, %v1077_v11  ;;  %v607_v34 = vmul.f32 1.4285715, %v599_v32 }
 0x251   :  { %v631_v7 = vsel %vm304_vm0, %v620_v31, 0.0  ;;  %v720_v36 = vadd.f32 -0.54918253, %v607_v34 }
 0x252   :  { %v632_v37 = vadd.f32 %v631_v7, %v630_v44 }
 0x253   :  { %v621_v39 = vmul.f32 %v720_v36, %v1088_v14 }
 0x255   :  { %v633_v47 = vsel %vm304_vm0, %v621_v39, 0.0 }
 0x256   :  { %v634_v33 = vadd.f32 %v633_v47, %v632_v37 }
 0x258   :  { %v635_v10 = vrot.slane %v634_v33, 4 }
 0x25a   :  { %v636_v48 = vadd.f32 %v635_v10, %v634_v33 }
 0x25c   :  { %v637_v50 = vrot.slane %v636_v48, 2 }
 0x25e   :  { %v638_v51 = vadd.f32 %v637_v50, %v636_v48 }
 0x260   :  { %v639_v52 = vrot.slane %v638_v51, 1 }
 0x262   :  { %v640_v11 = vadd.f32 %v639_v52, %v638_v51 }
 0x264   :  { %v644_v53 = vmul.f32 %v721_v45, %v640_v11 }
 0x266   :  { %645 = vst.msk [vmem:[%s1489_s2] sm:$0xff] %vm304_vm0, %v644_v53 }

</bundles_post_ra>
